<compile_context>
chip_gen: v6e
topology: v6e:2x2x1
jax: 0.10.0
libtpu: 0.0.40
codegen_flags: <defaults>
</compile_context>

<pallas_src>
import itertools

import numpy as np
import jax
import jax.numpy as jnp
from jax.experimental import pallas as pl
from jax.experimental.pallas import tpu as pltpu


_PACK = 2             # 8x8 blocks packed per lane-row in kernel 2 (2*64 = 128 lanes)
_MAX_ROW_TILE = 2048  # packed rows per grid step in kernel 2 (1 MB f32 buffer)


# ----------------------------------------------------------------------------
# Deterministic "parameters" (standard JPEG tables / DCT basis, as in DiffJPEG)
# ----------------------------------------------------------------------------
def _build_quant_tables():
    y_table = np.array(
        [[16, 11, 10, 16, 24, 40, 51, 61],
         [12, 12, 14, 19, 26, 58, 60, 55],
         [14, 13, 16, 24, 40, 57, 69, 56],
         [14, 17, 22, 29, 51, 87, 80, 62],
         [18, 22, 37, 56, 68, 109, 103, 77],
         [24, 35, 55, 64, 81, 104, 113, 92],
         [49, 64, 78, 87, 103, 121, 120, 101],
         [72, 92, 95, 98, 112, 100, 103, 99]], dtype=np.float32).T
    c_table = np.empty((8, 8), dtype=np.float32)
    c_table.fill(99)
    c_table[:4, :4] = np.array(
        [[17, 18, 24, 47], [18, 21, 26, 66],
         [24, 26, 56, 99], [47, 66, 99, 99]], dtype=np.float32).T
    return y_table.reshape(1, 64), c_table.reshape(1, 64)


def _build_dct_basis():
    t = np.zeros((8, 8, 8, 8), dtype=np.float32)
    for x, y, u, v in itertools.product(range(8), repeat=4):
        t[x, y, u, v] = (np.cos((2 * x + 1) * u * np.pi / 16)
                         * np.cos((2 * y + 1) * v * np.pi / 16))
    alpha = np.array([1.0 / np.sqrt(2)] + [1.0] * 7)
    scale = (np.outer(alpha, alpha) * 0.25).astype(np.float32)
    return t.reshape(64, 64), scale.reshape(1, 64)


_Y_TABLE_NP, _C_TABLE_NP = _build_quant_tables()
_DCT_MAT_NP, _DCT_SCALE_NP = _build_dct_basis()

# Block-diagonal DCT basis for _PACK blocks packed along lanes: (128, 128).
_DCT_PACKED_NP = np.kron(np.eye(_PACK, dtype=np.float32), _DCT_MAT_NP)
# scale / quant-table reciprocal rows (1, 64); 1/factor is folded in per image.
_Y_RECIP_NP = (_DCT_SCALE_NP / _Y_TABLE_NP).astype(np.float32)
_C_RECIP_NP = (_DCT_SCALE_NP / _C_TABLE_NP).astype(np.float32)

# RGB -> YCbCr coefficients with the x255 input scaling folded in.
_R2Y = 255.0 * np.array([[0.299, 0.587, 0.114],
                         [-0.168736, -0.331264, 0.5],
                         [0.5, -0.418688, -0.081312]], dtype=np.float32)

_VMEM_LIMIT = None


def _vmem_limit_bytes():
    """Per-generation scoped-VMEM limit (v7x has only 64 MiB physical)."""
    global _VMEM_LIMIT
    if _VMEM_LIMIT is None:
        try:
            cap = int(pltpu.get_tpu_info().vmem_capacity_bytes)
            _VMEM_LIMIT = max(32 * 1024 * 1024, min(64 * 1024 * 1024, cap // 2))
        except Exception:
            _VMEM_LIMIT = 32 * 1024 * 1024
    return _VMEM_LIMIT


def _pick_tile(dim, candidates):
    for t in candidates:
        if t <= dim and dim % t == 0:
            return t
    return dim


# ----------------------------------------------------------------------------
# Kernel 1: RGB -> centered YCbCr (JPEG matrix) + 2x2 chroma average pool.
# ----------------------------------------------------------------------------
def _rgb2ycbcr_pool_kernel(x_ref, ph_ref, pwt_ref, y_ref, cb_ref, cr_ref):
    # x_ref: (1, 3, TH, TW) in [0, 1]; ph: (TH/2, TH) bf16; pwt: (TW, TW/2) bf16.
    r = x_ref[0, 0, :, :]
    g = x_ref[0, 1, :, :]
    b = x_ref[0, 2, :, :]

    # Emit already-centered planes: Y - 128 directly; the chroma +128 shift and
    # kernel-2's -128 cancel, so chroma carries no shift at all.
    y_ref[0] = _R2Y[0, 0] * r + _R2Y[0, 1] * g + _R2Y[0, 2] * b - 128.0
    cbf = (_R2Y[1, 0] * r + _R2Y[1, 1] * g + _R2Y[1, 2] * b).astype(jnp.bfloat16)
    crf = (_R2Y[2, 0] * r + _R2Y[2, 1] * g + _R2Y[2, 2] * b).astype(jnp.bfloat16)

    ph = ph_ref[...]
    pwt = pwt_ref[...]
    # 2x2 average pool: row pairs via the tiny (TH/2, TH) 0.5-matrix, then
    # column pairs via the small (TW, TW/2) 0.5-matrix (bf16 MXU, f32 acc).
    cb_h = jnp.dot(ph, cbf, preferred_element_type=jnp.float32)
    cr_h = jnp.dot(ph, crf, preferred_element_type=jnp.float32)
    cb_ref[0] = jnp.dot(cb_h.astype(jnp.bfloat16), pwt,
                        preferred_element_type=jnp.float32)
    cr_ref[0] = jnp.dot(cr_h.astype(jnp.bfloat16), pwt,
                        preferred_element_type=jnp.float32)


def _rgb_to_ycbcr_420(image):
    """(B, 3, H, W) in [0,1] -> centered (Y-128, Cb-128, Cr-128) planes."""
    B, _, H, W = image.shape
    TH = _pick_tile(H, (256, 128, 64, 32, 16))
    TW = _pick_tile(W, (512, 256))
    # Guarantee >=2 grid steps so both v7x TensorCores get work.
    if B * (H // TH) * (W // TW) < 2 and TH >= 32:
        TH //= 2

    ph = np.zeros((TH // 2, TH), np.float32)
    ph[np.arange(TH // 2), 2 * np.arange(TH // 2)] = 0.5
    ph[np.arange(TH // 2), 2 * np.arange(TH // 2) + 1] = 0.5
    pwt = np.zeros((TW, TW // 2), np.float32)
    pwt[2 * np.arange(TW // 2), np.arange(TW // 2)] = 0.5
    pwt[2 * np.arange(TW // 2) + 1, np.arange(TW // 2)] = 0.5

    return pl.pallas_call(
        _rgb2ycbcr_pool_kernel,
        out_shape=(
            jax.ShapeDtypeStruct((B, H, W), jnp.float32),
            jax.ShapeDtypeStruct((B, H // 2, W // 2), jnp.float32),
            jax.ShapeDtypeStruct((B, H // 2, W // 2), jnp.float32),
        ),
        grid=(B, H // TH, W // TW),
        in_specs=[
            pl.BlockSpec((1, 3, TH, TW), lambda b, i, j: (b, 0, i, j)),
            pl.BlockSpec((TH // 2, TH), lambda b, i, j: (0, 0)),
            pl.BlockSpec((TW, TW // 2), lambda b, i, j: (0, 0)),
        ],
        out_specs=(
            pl.BlockSpec((1, TH, TW), lambda b, i, j: (b, i, j)),
            pl.BlockSpec((1, TH // 2, TW // 2), lambda b, i, j: (b, i, j)),
            pl.BlockSpec((1, TH // 2, TW // 2), lambda b, i, j: (b, i, j)),
        ),
        compiler_params=pltpu.CompilerParams(
            dimension_semantics=("parallel", "parallel", "parallel"),
            vmem_limit_bytes=_vmem_limit_bytes()),
    )(image, jnp.asarray(ph, jnp.bfloat16), jnp.asarray(pwt, jnp.bfloat16))


# ----------------------------------------------------------------------------
# Kernel 2: 2D DCT (block-diag 128x128 bf16 matmul), quantize, round.
# ----------------------------------------------------------------------------
def _dct_quant_kernel(x_ref, dct_ref, tab_ref, o_ref):
    # x_ref: (1, tm, 128) -- _PACK centered 8x8 blocks per lane-row (x*8+y).
    # dct_ref: (128, 128) block-diagonal DCT basis (bf16).
    # tab_ref: (1, 1, 128) per-image  scale / (quant_table * factor).
    x = x_ref[0].astype(jnp.bfloat16)
    y = jnp.dot(x, dct_ref[...], preferred_element_type=jnp.float32)
    o_ref[0] = jnp.round(y * tab_ref[0])


def _row_tiling(nb):
    """#blocks -> (padded packed-row count, row-tile size)."""
    rows = -(-nb // _PACK)            # packed rows needed
    rows = -(-rows // 8) * 8          # sublane alignment
    tm = min(_MAX_ROW_TILE, rows)
    if rows // tm < 2 and rows >= 16:  # >=2 grid steps for v7x's second core
        tm = -(-(rows // 2) // 8) * 8
    rows_pad = -(-rows // tm) * tm
    return rows_pad, tm


def _blockify(plane):
    """(B, H, W) -> (B, num_blocks, 64), blocks in BlockSplitting order."""
    B, H, W = plane.shape
    nb = (H // 8) * (W // 8)
    x = plane.reshape(B, H // 8, 8, W // 8, 8)
    return x.transpose(0, 1, 3, 2, 4).reshape(B, nb, 64)


def _dct_quantize(blocks64, recip_tab, dct_bf16):
    """blocks64: (B, nb, 64) centered; recip_tab: (B, 1, 128) -> (B, nb, 8, 8)."""
    B, nb, _ = blocks64.shape
    rows_pad, tm = _row_tiling(nb)
    nb_pad = rows_pad * _PACK
    lanes = 64 * _PACK
    if nb_pad != nb:
        # Padded blocks are zeros -> DCT/quant output is exactly zero (sliced off).
        blocks64 = jnp.pad(blocks64, ((0, 0), (0, nb_pad - nb), (0, 0)))
    packed = blocks64.reshape(B, rows_pad, lanes)

    out = pl.pallas_call(
        _dct_quant_kernel,
        out_shape=jax.ShapeDtypeStruct((B, rows_pad, lanes), jnp.float32),
        grid=(B, rows_pad // tm),
        in_specs=[
            pl.BlockSpec((1, tm, lanes), lambda b, i: (b, i, 0)),
            pl.BlockSpec((lanes, lanes), lambda b, i: (0, 0)),
            pl.BlockSpec((1, 1, lanes), lambda b, i: (b, 0, 0)),
        ],
        out_specs=pl.BlockSpec((1, tm, lanes), lambda b, i: (b, i, 0)),
        compiler_params=pltpu.CompilerParams(
            dimension_semantics=("parallel", "parallel"),
            vmem_limit_bytes=_vmem_limit_bytes()),
    )(packed, dct_bf16, recip_tab)

    out = out.reshape(B, nb_pad, 8, 8)
    return out[:, :nb] if nb_pad != nb else out


# ----------------------------------------------------------------------------
# Full CompressJpeg forward
# ----------------------------------------------------------------------------
def compress_jpeg(image, factor=1.0):
    """image: (B, 3, H, W) float32 in [0, 1], H/W multiples of 16.
    factor: python scalar or (B,) array.
    Returns (y, cb, cr), each (B, num_blocks, 8, 8) float32."""
    B, C, H, W = image.shape
    assert C == 3 and H % 16 == 0 and W % 16 == 0

    y, cb, cr = _rgb_to_ycbcr_420(image.astype(jnp.float32))

    fac = jnp.asarray(factor, jnp.float32)
    fac = jnp.full((B,), fac) if fac.ndim == 0 else fac.reshape(B)
    inv_fac = (1.0 / fac)[:, None, None]                                    # (B,1,1)
    y_tab = jnp.tile(jnp.asarray(_Y_RECIP_NP), (1, _PACK))[None] * inv_fac  # (B,1,128)
    c_tab = jnp.tile(jnp.asarray(_C_RECIP_NP), (1, _PACK))[None] * inv_fac  # (B,1,128)
    dct_bf16 = jnp.asarray(_DCT_PACKED_NP, dtype=jnp.bfloat16)

    y_q = _dct_quantize(_blockify(y), y_tab, dct_bf16)

    # Cb and Cr share the quant table -> one fused pallas_call for both.
    nb_c = (H // 16) * (W // 16)
    c_blocks = jnp.concatenate([_blockify(cb), _blockify(cr)], axis=1)
    c_q = _dct_quantize(c_blocks, c_tab, dct_bf16)
    return y_q, c_q[:, :nb_c], c_q[:, nb_c:2 * nb_c]


# ----------------------------------------------------------------------------
# Pure-numpy reference (mirrors the torch module) for a sanity check.
# ----------------------------------------------------------------------------
def _reference_compress(image, factor=1.0):
    img = np.asarray(image, np.float32) * 255.0
    B, _, H, W = img.shape
    r, g, b = img[:, 0], img[:, 1], img[:, 2]
    y = 0.299 * r + 0.587 * g + 0.114 * b
    cb = -0.168736 * r - 0.331264 * g + 0.5 * b + 128.0
    cr = 0.5 * r - 0.418688 * g - 0.081312 * b + 128.0

    def pool(x):
        return x.reshape(B, H // 2, 2, W // 2, 2).mean(axis=(2, 4))

    cb, cr = pool(cb), pool(cr)
    t = _DCT_MAT_NP.reshape(8, 8, 8, 8)
    scale = _DCT_SCALE_NP.reshape(8, 8)
    fac = np.broadcast_to(np.asarray(factor, np.float32), (B,))

    def dct_quant(plane, table):
        Bp, Hp, Wp = plane.shape
        blocks = plane.reshape(Bp, Hp // 8, 8, Wp // 8, 8).transpose(0, 1, 3, 2, 4)
        blocks = blocks.reshape(Bp, -1, 8, 8) - 128.0
        coef = scale * np.tensordot(blocks, t, axes=2)
        q = coef / (table.reshape(8, 8) * fac[:, None, None, None])
        return np.round(q)  # numpy round is half-to-even, like torch.round

    return (dct_quant(y, _Y_TABLE_NP), dct_quant(cb, _C_TABLE_NP),
            dct_quant(cr, _C_TABLE_NP))


def _check(got, ref, tol=2.0):
    err = float(np.max(np.abs(np.asarray(got) - ref)))
    # A layout/table bug gives errors in the tens/hundreds; bf16 MXU operands
    # plus fp re-association can at most flip a rounding decision or two.
    assert err <= tol, f"max abs diff {err}"


if __name__ == "__main__":
    key = jax.random.PRNGKey(0)
    run = jax.jit(compress_jpeg)

    # Case 1: small batch, scalar factor.
    B, H, W = 2, 16, 16
    img = jax.random.uniform(key, (B, 3, H, W), dtype=jnp.float32)
    y_q, cb_q, cr_q = run(img, 1.0)
    jax.block_until_ready((y_q, cb_q, cr_q))

    assert y_q.shape == (B, (H // 8) * (W // 8), 8, 8)
    assert cb_q.shape == (B, (H // 16) * (W // 16), 8, 8)
    assert cr_q.shape == (B, (H // 16) * (W // 16), 8, 8)
    assert y_q.dtype == jnp.float32

    y_r, cb_r, cr_r = _reference_compress(np.asarray(img), 1.0)
    _check(y_q, y_r); _check(cb_q, cb_r); _check(cr_q, cr_r)

    # Case 2: taller image (multi-tile grids in both kernels), per-image factor.
    B2, H2, W2 = 1, 128, 64
    img2 = jax.random.uniform(jax.random.PRNGKey(1), (B2, 3, H2, W2),
                              dtype=jnp.float32)
    fac2 = jnp.array([0.5], dtype=jnp.float32)
    y2, cb2, cr2 = run(img2, fac2)
    jax.block_until_ready((y2, cb2, cr2))

    assert y2.shape == (B2, (H2 // 8) * (W2 // 8), 8, 8)
    assert cb2.shape == (B2, (H2 // 16) * (W2 // 16), 8, 8)

    y2_r, cb2_r, cr2_r = _reference_compress(np.asarray(img2), np.asarray(fac2))
    _check(y2, y2_r); _check(cb2, cb2_r); _check(cr2, cr2_r)

    print("KERNEL_OK")
</pallas_src>

<mosaic_0001>
module attributes {stable_mosaic.version = 11 : i64} {
  func.func @_rgb2ycbcr_pool_kernel(%arg0: i32, %arg1: i32, %arg2: i32, %arg3: memref<1x3x16x16xf32, #tpu.memory_space<vmem>>, %arg4: memref<8x16xbf16, #tpu.memory_space<vmem>>, %arg5: memref<16x8xbf16, #tpu.memory_space<vmem>>, %arg6: memref<1x16x16xf32, #tpu.memory_space<vmem>>, %arg7: memref<1x8x8xf32, #tpu.memory_space<vmem>>, %arg8: memref<1x8x8xf32, #tpu.memory_space<vmem>>) attributes {dimension_semantics = [#tpu.dimension_semantics<parallel>, #tpu.dimension_semantics<parallel>, #tpu.dimension_semantics<parallel>], iteration_bounds = array<i64: 2, 1, 1>, scalar_prefetch = 0 : i64, scratch_operands = 0 : i64, tpu.core_type = #tpu.core_type<tc>, window_params = [{transform_indices = @transform_0, window_bounds = array<i64: 1, 3, 16, 16>}, {pipeline_mode = #tpu.pipeline_mode<synchronous>, transform_indices = @transform_1, window_bounds = array<i64: 8, 16>}, {pipeline_mode = #tpu.pipeline_mode<synchronous>, transform_indices = @transform_2, window_bounds = array<i64: 16, 8>}, {transform_indices = @transform_3, window_bounds = array<i64: 1, 16, 16>}, {transform_indices = @transform_4, window_bounds = array<i64: 1, 8, 8>}, {transform_indices = @transform_5, window_bounds = array<i64: 1, 8, 8>}]} {
    %c0 = arith.constant 0 : index
    %c0_0 = arith.constant 0 : index
    %c0_1 = arith.constant 0 : index
    %c0_2 = arith.constant 0 : index
    %0 = vector.load %arg3[%c0, %c0_0, %c0_1, %c0_2] : memref<1x3x16x16xf32, #tpu.memory_space<vmem>>, vector<1x1x16x16xf32>
    %1 = vector.shape_cast %0 : vector<1x1x16x16xf32> to vector<16x16xf32>
    %c0_3 = arith.constant 0 : index
    %c1 = arith.constant 1 : index
    %c0_4 = arith.constant 0 : index
    %c0_5 = arith.constant 0 : index
    %2 = vector.load %arg3[%c0_3, %c1, %c0_4, %c0_5] : memref<1x3x16x16xf32, #tpu.memory_space<vmem>>, vector<1x1x16x16xf32>
    %3 = vector.shape_cast %2 : vector<1x1x16x16xf32> to vector<16x16xf32>
    %c0_6 = arith.constant 0 : index
    %c2 = arith.constant 2 : index
    %c0_7 = arith.constant 0 : index
    %c0_8 = arith.constant 0 : index
    %4 = vector.load %arg3[%c0_6, %c2, %c0_7, %c0_8] : memref<1x3x16x16xf32, #tpu.memory_space<vmem>>, vector<1x1x16x16xf32>
    %5 = vector.shape_cast %4 : vector<1x1x16x16xf32> to vector<16x16xf32>
    %cst = arith.constant 76.2449951 : f32
    %6 = vector.broadcast %cst : f32 to vector<16x16xf32>
    %7 = arith.mulf %6, %1 : vector<16x16xf32>
    %cst_9 = arith.constant 1.496850e+02 : f32
    %8 = vector.broadcast %cst_9 : f32 to vector<16x16xf32>
    %9 = arith.mulf %8, %3 : vector<16x16xf32>
    %10 = arith.addf %7, %9 : vector<16x16xf32>
    %cst_10 = arith.constant 2.907000e+01 : f32
    %11 = vector.broadcast %cst_10 : f32 to vector<16x16xf32>
    %12 = arith.mulf %11, %5 : vector<16x16xf32>
    %13 = arith.addf %10, %12 : vector<16x16xf32>
    %cst_11 = arith.constant 1.280000e+02 : f32
    %14 = vector.broadcast %cst_11 : f32 to vector<16x16xf32>
    %15 = arith.subf %13, %14 : vector<16x16xf32>
    %c0_12 = arith.constant 0 : index
    %c0_13 = arith.constant 0 : index
    %c0_14 = arith.constant 0 : index
    %16 = vector.load %arg6[%c0_12, %c0_13, %c0_14] : memref<1x16x16xf32, #tpu.memory_space<vmem>>, vector<1x16x16xf32>
    %17 = vector.shape_cast %16 : vector<1x16x16xf32> to vector<16x16xf32>
    %18 = vector.shape_cast %15 : vector<16x16xf32> to vector<1x16x16xf32>
    tpu.vector_store %arg6[%c0_12, %c0_13, %c0_14], %18 {strides = array<i32>} : memref<1x16x16xf32, #tpu.memory_space<vmem>>, vector<1x16x16xf32>,
    %cst_15 = arith.constant -43.0276794 : f32
    %19 = vector.broadcast %cst_15 : f32 to vector<16x16xf32>
    %20 = arith.mulf %19, %1 : vector<16x16xf32>
    %cst_16 = arith.constant -84.4723205 : f32
    %21 = vector.broadcast %cst_16 : f32 to vector<16x16xf32>
    %22 = arith.mulf %21, %3 : vector<16x16xf32>
    %23 = arith.addf %20, %22 : vector<16x16xf32>
    %cst_17 = arith.constant 1.275000e+02 : f32
    %24 = vector.broadcast %cst_17 : f32 to vector<16x16xf32>
    %25 = arith.mulf %24, %5 : vector<16x16xf32>
    %26 = arith.addf %23, %25 : vector<16x16xf32>
    %27 = arith.truncf %26 : vector<16x16xf32> to vector<16x16xbf16>
    %cst_18 = arith.constant 1.275000e+02 : f32
    %28 = vector.broadcast %cst_18 : f32 to vector<16x16xf32>
    %29 = arith.mulf %28, %1 : vector<16x16xf32>
    %cst_19 = arith.constant -106.765442 : f32
    %30 = vector.broadcast %cst_19 : f32 to vector<16x16xf32>
    %31 = arith.mulf %30, %3 : vector<16x16xf32>
    %32 = arith.addf %29, %31 : vector<16x16xf32>
    %cst_20 = arith.constant -20.73456 : f32
    %33 = vector.broadcast %cst_20 : f32 to vector<16x16xf32>
    %34 = arith.mulf %33, %5 : vector<16x16xf32>
    %35 = arith.addf %32, %34 : vector<16x16xf32>
    %36 = arith.truncf %35 : vector<16x16xf32> to vector<16x16xbf16>
    %c0_21 = arith.constant 0 : index
    %c0_22 = arith.constant 0 : index
    %37 = vector.load %arg4[%c0_21, %c0_22] : memref<8x16xbf16, #tpu.memory_space<vmem>>, vector<8x16xbf16>
    %c0_23 = arith.constant 0 : index
    %c0_24 = arith.constant 0 : index
    %38 = vector.load %arg5[%c0_23, %c0_24] : memref<16x8xbf16, #tpu.memory_space<vmem>>, vector<16x8xbf16>
    %cst_25 = arith.constant dense<0.000000e+00> : vector<8x16xf32>
    %39 = tpu.matmul %37, %27, %cst_25 {dimension_numbers = #tpu.dot_dimension_numbers<[1], [0], [0], [1], [0, 0, 1, 1], [], []>} : vector<8x16xbf16>, vector<16x16xbf16>, vector<8x16xf32> -> vector<8x16xf32>
    %cst_26 = arith.constant dense<0.000000e+00> : vector<8x16xf32>
    %40 = tpu.matmul %37, %36, %cst_26 {dimension_numbers = #tpu.dot_dimension_numbers<[1], [0], [0], [1], [0, 0, 1, 1], [], []>} : vector<8x16xbf16>, vector<16x16xbf16>, vector<8x16xf32> -> vector<8x16xf32>
    %41 = arith.truncf %39 : vector<8x16xf32> to vector<8x16xbf16>
    %cst_27 = arith.constant dense<0.000000e+00> : vector<8x8xf32>
    %42 = tpu.matmul %41, %38, %cst_27 {dimension_numbers = #tpu.dot_dimension_numbers<[1], [0], [0], [1], [0, 0, 1, 1], [], []>} : vector<8x16xbf16>, vector<16x8xbf16>, vector<8x8xf32> -> vector<8x8xf32>
    %c0_28 = arith.constant 0 : index
    %c0_29 = arith.constant 0 : index
    %c0_30 = arith.constant 0 : index
    %43 = vector.load %arg7[%c0_28, %c0_29, %c0_30] : memref<1x8x8xf32, #tpu.memory_space<vmem>>, vector<1x8x8xf32>
    %44 = vector.shape_cast %43 : vector<1x8x8xf32> to vector<8x8xf32>
    %45 = vector.shape_cast %42 : vector<8x8xf32> to vector<1x8x8xf32>
    tpu.vector_store %arg7[%c0_28, %c0_29, %c0_30], %45 {strides = array<i32>} : memref<1x8x8xf32, #tpu.memory_space<vmem>>, vector<1x8x8xf32>,
    %46 = arith.truncf %40 : vector<8x16xf32> to vector<8x16xbf16>
    %cst_31 = arith.constant dense<0.000000e+00> : vector<8x8xf32>
    %47 = tpu.matmul %46, %38, %cst_31 {dimension_numbers = #tpu.dot_dimension_numbers<[1], [0], [0], [1], [0, 0, 1, 1], [], []>} : vector<8x16xbf16>, vector<16x8xbf16>, vector<8x8xf32> -> vector<8x8xf32>
    %c0_32 = arith.constant 0 : index
    %c0_33 = arith.constant 0 : index
    %c0_34 = arith.constant 0 : index
    %48 = vector.load %arg8[%c0_32, %c0_33, %c0_34] : memref<1x8x8xf32, #tpu.memory_space<vmem>>, vector<1x8x8xf32>
    %49 = vector.shape_cast %48 : vector<1x8x8xf32> to vector<8x8xf32>
    %50 = vector.shape_cast %47 : vector<8x8xf32> to vector<1x8x8xf32>
    tpu.vector_store %arg8[%c0_32, %c0_33, %c0_34], %50 {strides = array<i32>} : memref<1x8x8xf32, #tpu.memory_space<vmem>>, vector<1x8x8xf32>,
    return
  }
  func.func @transform_0(%arg0: i32, %arg1: i32, %arg2: i32) -> (i32, i32, i32, i32) {
    %c0_i32 = arith.constant 0 : i32
    %c0_i32_0 = arith.constant 0 : i32
    return %arg0, %c0_i32, %arg1, %arg2 : i32, i32, i32, i32
  }
  func.func @transform_1(%arg0: i32, %arg1: i32, %arg2: i32) -> (i32, i32) {
    %c0_i32 = arith.constant 0 : i32
    %c0_i32_0 = arith.constant 0 : i32
    %c0_i32_1 = arith.constant 0 : i32
    return %c0_i32, %c0_i32_0 : i32, i32
  }
  func.func @transform_2(%arg0: i32, %arg1: i32, %arg2: i32) -> (i32, i32) {
    %c0_i32 = arith.constant 0 : i32
    %c0_i32_0 = arith.constant 0 : i32
    %c0_i32_1 = arith.constant 0 : i32
    return %c0_i32, %c0_i32_0 : i32, i32
  }
  func.func @transform_3(%arg0: i32, %arg1: i32, %arg2: i32) -> (i32, i32, i32) {
    %c0_i32 = arith.constant 0 : i32
    return %arg0, %arg1, %arg2 : i32, i32, i32
  }
  func.func @transform_4(%arg0: i32, %arg1: i32, %arg2: i32) -> (i32, i32, i32) {
    %c0_i32 = arith.constant 0 : i32
    return %arg0, %arg1, %arg2 : i32, i32, i32
  }
  func.func @transform_5(%arg0: i32, %arg1: i32, %arg2: i32) -> (i32, i32, i32) {
    %c0_i32 = arith.constant 0 : i32
    return %arg0, %arg1, %arg2 : i32, i32, i32
  }
}

module attributes {stable_mosaic.version = 11 : i64} {
  func.func @_dct_quant_kernel(%arg0: i32, %arg1: i32, %arg2: memref<1x8x128xf32, #tpu.memory_space<vmem>>, %arg3: memref<128x128xbf16, #tpu.memory_space<vmem>>, %arg4: memref<1x1x128xf32, #tpu.memory_space<vmem>>, %arg5: memref<1x8x128xf32, #tpu.memory_space<vmem>>) attributes {dimension_semantics = [#tpu.dimension_semantics<parallel>, #tpu.dimension_semantics<parallel>], iteration_bounds = array<i64: 2, 1>, scalar_prefetch = 0 : i64, scratch_operands = 0 : i64, tpu.core_type = #tpu.core_type<tc>, window_params = [{transform_indices = @transform_0, window_bounds = array<i64: 1, 8, 128>}, {pipeline_mode = #tpu.pipeline_mode<synchronous>, transform_indices = @transform_1, window_bounds = array<i64: 128, 128>}, {transform_indices = @transform_2, window_bounds = array<i64: 1, 1, 128>}, {transform_indices = @transform_3, window_bounds = array<i64: 1, 8, 128>}]} {
    %c0 = arith.constant 0 : index
    %c0_0 = arith.constant 0 : index
    %c0_1 = arith.constant 0 : index
    %0 = vector.load %arg2[%c0, %c0_0, %c0_1] : memref<1x8x128xf32, #tpu.memory_space<vmem>>, vector<1x8x128xf32>
    %1 = vector.shape_cast %0 : vector<1x8x128xf32> to vector<8x128xf32>
    %2 = arith.truncf %1 : vector<8x128xf32> to vector<8x128xbf16>
    %c0_2 = arith.constant 0 : index
    %c0_3 = arith.constant 0 : index
    %3 = vector.load %arg3[%c0_2, %c0_3] : memref<128x128xbf16, #tpu.memory_space<vmem>>, vector<128x128xbf16>
    %cst = arith.constant dense<0.000000e+00> : vector<8x128xf32>
    %4 = tpu.matmul %2, %3, %cst {dimension_numbers = #tpu.dot_dimension_numbers<[1], [0], [0], [1], [0, 0, 1, 1], [], []>} : vector<8x128xbf16>, vector<128x128xbf16>, vector<8x128xf32> -> vector<8x128xf32>
    %c0_4 = arith.constant 0 : index
    %c0_5 = arith.constant 0 : index
    %c0_6 = arith.constant 0 : index
    %5 = vector.load %arg4[%c0_4, %c0_5, %c0_6] : memref<1x1x128xf32, #tpu.memory_space<vmem>>, vector<1x1x128xf32>
    %6 = vector.shape_cast %5 : vector<1x1x128xf32> to vector<1x128xf32>
    %7 = vector.broadcast %6 : vector<1x128xf32> to vector<8x128xf32>
    %8 = arith.mulf %4, %7 : vector<8x128xf32>
    %9 = math.roundeven %8 : vector<8x128xf32>
    %c0_7 = arith.constant 0 : index
    %c0_8 = arith.constant 0 : index
    %c0_9 = arith.constant 0 : index
    %10 = vector.load %arg5[%c0_7, %c0_8, %c0_9] : memref<1x8x128xf32, #tpu.memory_space<vmem>>, vector<1x8x128xf32>
    %11 = vector.shape_cast %10 : vector<1x8x128xf32> to vector<8x128xf32>
    %12 = vector.shape_cast %9 : vector<8x128xf32> to vector<1x8x128xf32>
    tpu.vector_store %arg5[%c0_7, %c0_8, %c0_9], %12 {strides = array<i32>} : memref<1x8x128xf32, #tpu.memory_space<vmem>>, vector<1x8x128xf32>,
    return
  }
  func.func @transform_0(%arg0: i32, %arg1: i32) -> (i32, i32, i32) {
    %c0_i32 = arith.constant 0 : i32
    %c0_i32_0 = arith.constant 0 : i32
    return %arg0, %arg1, %c0_i32 : i32, i32, i32
  }
  func.func @transform_1(%arg0: i32, %arg1: i32) -> (i32, i32) {
    %c0_i32 = arith.constant 0 : i32
    %c0_i32_0 = arith.constant 0 : i32
    %c0_i32_1 = arith.constant 0 : i32
    return %c0_i32, %c0_i32_0 : i32, i32
  }
  func.func @transform_2(%arg0: i32, %arg1: i32) -> (i32, i32, i32) {
    %c0_i32 = arith.constant 0 : i32
    %c0_i32_0 = arith.constant 0 : i32
    %c0_i32_1 = arith.constant 0 : i32
    return %arg0, %c0_i32, %c0_i32_0 : i32, i32, i32
  }
  func.func @transform_3(%arg0: i32, %arg1: i32) -> (i32, i32, i32) {
    %c0_i32 = arith.constant 0 : i32
    %c0_i32_0 = arith.constant 0 : i32
    return %arg0, %arg1, %c0_i32 : i32, i32, i32
  }
}

</mosaic_0001>

<bundles_post_ra>
// kernel: compress_jpeg.3
= control target key start
LH: loop header
LB: loop body
LE: loop exit
PB: predicated region body
PF: predicated region fallthrough
CT: control target
= control target key end

     0   :  { %11 = vsyncpa [#allocation3], 0  ;;  %s1130_s0 = inlined_call_operand.hbm [shape: f32[2,3,16,16], index: 0, kind: input, shape index: {}]   ;;  %s1131_s1 = inlined_call_operand.vmem [shape: bf16[8,16], index: 1, kind: input, shape index: {}]   ;;  %s1132_s2 = inlined_call_operand.vmem [shape: bf16[16,8], index: 2, kind: input, shape index: {}]   ;;  %s1133_s3 = inlined_call_operand.vmem [shape: f32[2,16,16], index: 3, kind: output, shape index: {0}]   ;;  %s1134_s4 = inlined_call_operand.vmem [shape: f32[2,8,8], index: 4, kind: output, shape index: {1}]   ;;  %s1135_s5 = inlined_call_operand.vmem [shape: f32[2,8,8], index: 5, kind: output, shape index: {2}]  }
   0x1   :  { %13 = vsyncpa [#allocation3 + $0x1], 0  ;;  %s1018_s18 = smov 0   ;;  %s1020_s19 = smov 0  }
   0x2   :  { %s1022_s20 = smov 0   ;;  %s1024_s21 = smov 0  }
   0x3   :  { %s1026_s22 = smov 0   ;;  %s1028_s23 = smov 0  }
   0x4 LB: > { %s784_s24 = sadd.s32 4294967295, %s981_s23   ;;  %s38_s25 = sadd.s32 1, %s977_s22  ;;  %s981_s23 = sphi %s1028_s23, %s19_s23   ;;  %s977_s22 = sphi %s1026_s22, %s1142_s22   ;;  %s973_s21 = sphi %s1024_s21, %s1141_s21   ;;  %s969_s20 = sphi %s1022_s20, %s1140_s20   ;;  %s965_s19 = sphi %s1020_s19, %s1139_s19   ;;  %s961_s18 = sphi %s1018_s18, %s1138_s18  }
   0x5   : > { %p40_p0 = scmp.ge.s32.totalorder %s38_s25, 2  ;;  %s49_s26 = sadd.s32 1, %s969_s20 }
   0x6   : > { %p56_p1 = scmp.ne.s32.totalorder %s969_s20, %s965_s19  ;;  %p57_p2 = scmp.eq.s32.totalorder %s981_s23, 0 }
   0x7   : > { %s1144_s25 = smov (%p40_p0, %s38_s25), 0  ;;  %p62_p4 = scmp.ne.s32.totalorder %s965_s19, %s961_s18 }
   0x8   : > { %p58_p3 = por %p57_p2, %p56_p1  ;;  %s42_s27 = ssub.s32 %s977_s22, %s1144_s25 }
   0x9   : > { %p63_p5 = scmp.eq.s32.totalorder %s784_s24, 0  ;;  %p47_p6 = scmp.eq.s32.totalorder %s42_s27, 0 }
   0xa   : > { %p849_p8 = scmp.lt.s32.totalorder %s981_s23, 2  ;;  %s224_s30 = sand.u32 1, %s969_s20  }
   0xb   : > { %p1057_p7 = por %p63_p5, %p62_p4  ;;  %s841_s6 = smul.u32 768, %s977_s22 }
   0xc   : > { %s1063_s29 = scalar_select %p47_p6, %s969_s20, %s49_s26  }
   0xd   : > { %s840_s7 = smul.u32 48, %s224_s30  ;;  %s237_s10 = scalar_lea.hbm %s1130_s0, %s841_s6 }
   0xe   : > { %p1070_p9 = pnand %p849_p8, %p58_p3  ;;  %s225_s14 = scalar_lea.sflag [#allocation3], %s224_s30 }
   0xf   : > { %s228_s12 = scalar_lea.vmem [#allocation2], %s840_s7  ;;  %s983_s16 = smov [#allocation2]  }
  0x10   : > { %s238_s13 = sshll.u32 %s228_s12, 4  ;;  %p905_p10 = pneg %p1070_p9  ;;  %s239_s13 = int_to_ptr.vmem [resolvable:$true] %s238_s13 }
  0x11   : > { %s916_s15 = scalar_lea.vmem %s239_s13, 768  ;;  %s921_s17 = sshll.u32 %s983_s16, 4  ;;  %s922_s17 = int_to_ptr.vmem [resolvable:$false] %s921_s17 }
  0x12   : > { %p917_p11 = scmp.ne.s32.totalorder %s239_s13, %s916_s15  ;;  %s923_s18 = scalar_lea.vmem %s922_s17, 1536 }
  0x13   : > { %p924_p0 = scmp.lt.s32.totalorder %s239_s13, %s922_s17  ;;  %p925_p1 = scmp.lt.s32.totalorder %s923_s18, %s916_s15 }
  0x14   : > { %p919_p12 = pnand %p917_p11, %p905_p10 }
  0x15   : > { %p926_p2 = por %p925_p1, %p924_p0 }
  0x16   : > { %p920_p13 = pneg %p919_p12 }
  0x18   : > { %p927_p3 = pnand %p926_p2, %p920_p13 }
  0x1a   : > { %930 = shalt.err (!%p927_p3)
}
  0x1b   : > { %s984_s24 = smov 128   ;;  %s985_s26 = smov 8  }
  0x1c   : > { %848 = dma.hbm_to_vmem [thread:$0]  (!%p1070_p9), %s237_s10, 768, %s239_s13, %s225_s14, %s984_s24, %s984_s24, %s985_s26  }
  0x1d   : > { %p789_p4 = scmp.ge.s32.totalorder %s981_s23, 1  ;;  %p246_p5 = scmp.lt.s32.totalorder %s981_s23, 3 }
  0x1f   : > { %p247_p6 = pnand %p789_p4, %p246_p5 }
  0x20   : > { %s252_s27 = sand.u32 (!%p247_p6), 1, %s965_s19  }
  0x21   : > { %250 = sbr.rel (%p247_p6) target bundleno = 451 (0x1c3), region = 32  ;;  %s253_s6 = scalar_lea.sflag (!%p247_p6), [#allocation3], %s252_s27 }
  0x22   : > { %s842_s30 = smul.u32 (!%p247_p6), 48, %s252_s27 }
  0x24   : > { %s256_s7 = scalar_lea.vmem (!%p247_p6), [#allocation2], %s842_s30 }
  0x26   : > { %956 = dma.done.wait (%p1057_p7), %s253_s6, 768  }
  0x27   : > { %958 = vsyncadd (%p1057_p7), %s253_s6, 4294966528  ;;  %v986_v0 = vmov 0.0   ;;  %vm987_vm0 = vmmov 0   ;;  %v345_v1 = vld [vmem:[%s256_s7] sm:$0xff]  ;;  %v346_v2 = vld [vmem:[%s256_s7 + $0x8] sm:$0xff]  ;;  %vm365_vm1 = vcmask 130048  }
  0x28   : > { %816 = vmatprep.subr.bf16.mxu0 %v986_v0  ;;  %822 = vmatprep.subr.bf16.mxu1 %v986_v0  ;;  %v794_v3 = vld [vmem:[%s256_s7 + $0x10] sm:$0xff]  ;;  %v795_v4 = vld [vmem:[%s256_s7 + $0x18] sm:$0xff]  ;;  %v796_v5 = vld [vmem:[%s256_s7 + $0x20] sm:$0xff]  ;;  %v353_v7 = vmul.f32 76.244995, %v345_v1  ;;  %v379_v8 = vmul.f32 127.5, %v345_v1 }
  0x29   : > { %818 = vmatprep.mubr.msk.bf16.mxu0 %vm987_vm0, %v986_v0  ;;  %824 = vmatprep.mubr.msk.bf16.mxu1 %vm987_vm0, %v986_v0  ;;  %v797_v6 = vld [vmem:[%s256_s7 + $0x28] sm:$0xff]  ;;  %v354_v9 = vmul.f32 76.244995, %v346_v2  ;;  %v355_v10 = vmul.f32 149.685, %v794_v3  ;;  %v374_v20 = vmul.f32 127.5, %v796_v5 }
  0x2a   : > { %v356_v11 = vmul.f32 149.685, %v795_v4  ;;  %v359_v12 = vmul.f32 29.07, %v796_v5  ;;  %v360_v13 = vmul.f32 29.07, %v797_v6 }
  0x2b   : > { %v368_v14 = vmul.f32 -43.02768, %v345_v1  ;;  %v357_v15 = vadd.f32 %v355_v10, %v353_v7  ;;  %v369_v17 = vmul.f32 -43.02768, %v346_v2  ;;  %v370_v18 = vmul.f32 -84.47232, %v794_v3 }
  0x2c   : > { %v358_v16 = vadd.f32 %v356_v11, %v354_v9  ;;  %v371_v19 = vmul.f32 -84.47232, %v795_v4  ;;  %v375_v21 = vmul.f32 127.5, %v797_v6  ;;  %v380_v22 = vmul.f32 127.5, %v346_v2  ;;  %v390_v39 = vld [vmem:[%s1131_s1] sm:$0xf] }
  0x2d   : > { %v361_v23 = vadd.f32 %v359_v12, %v357_v15  ;;  %v372_v25 = vadd.f32 %v370_v18, %v368_v14  ;;  %v381_v26 = vmul.f32 -106.76544, %v794_v3  ;;  %v382_v28 = vmul.f32 -106.76544, %v795_v4  ;;  %v902_v40 = vld [vmem:[%s1132_s2] sm:$0xff]   ;;  %p312_p7 = scmp.lt.s32.totalorder %s973_s21, 1 }
  0x2e   : > { %v362_v24 = vadd.f32 %v360_v13, %v358_v16  ;;  %v373_v27 = vadd.f32 %v371_v19, %v369_v17  ;;  %v385_v29 = vmul.f32 -20.73456, %v796_v5  ;;  %v386_v30 = vmul.f32 -20.73456, %v797_v6 }
  0x2f   : > { %v376_v31 = vadd.f32 %v374_v20, %v372_v25  ;;  %v383_v32 = vadd.f32 %v381_v26, %v379_v8  ;;  %v384_v34 = vadd.f32 %v382_v28, %v380_v22  ;;  %v798_v41 = vadd.f32 -128.0, %v361_v23  ;;  %s1146_s21 = smov (!%p312_p7, %s973_s21), 1 }
  0x30   : > { %v377_v33 = vadd.f32 %v375_v21, %v373_v27  ;;  %v799_v42 = vadd.f32 -128.0, %v362_v24  ;;  %s807_s11 = sshll.u32 %s1146_s21, 4  ;;  %s792_s15 = sshll.u32 %s1146_s21, 3  ;;  %vm526_vm2 = vcmask 64512  }
  0x31   : > { %v387_v35 = vadd.f32 %v385_v29, %v383_v32  ;;  %v388_v37 = vadd.f32 %v386_v30, %v384_v34  ;;  %s322_s14 = scalar_lea.vmem %s1133_s3, %s807_s11  ;;  %s333_s18 = scalar_lea.vmem %s1134_s4, %s792_s15 }
  0x32   : > { %v378_v36 = vpack.c.bf16 %v377_v33, %v376_v31  ;;  %366 = vst.msk [vmem:[%s322_s14] sm:$0xff] %vm365_vm1, %v798_v41  ;;  %367 = vst.msk [vmem:[%s322_s14 + $0x8] sm:$0xff] %vm365_vm1, %v799_v42  ;;  %s343_s27 = scalar_lea.vmem %s1135_s5, %s792_s15 }
  0x33   : > { %v389_v38 = vpack.c.bf16 %v388_v37, %v387_v35 }
  0x34   : > { %817 = vmatpush3.bf16.msra.mxu0 %v378_v36 }
  0x35   : > { %828 = vmatprep.subr.bf16.mxu0 %v986_v0  ;;  %823 = vmatpush3.bf16.msra.mxu1 %v389_v38 }
  0x36   : > { %834 = vmatprep.subr.bf16.mxu1 %v986_v0 }
  0x37   : > { %819 = vmatmul.mubr.msk.bf16.vlgmr.msra.gmra.mxu0 %vm365_vm1, %v390_v39 }
  0x38   : > { %829 = vmatpush3.bf16.msra.mxu0 %v902_v40  ;;  %830 = vmatprep.mubr.msk.bf16.mxu0 %vm987_vm0, %v986_v0 }
  0x39   : > { %825 = vmatmul.mubr.msk.bf16.vlgmr.msra.gmra.mxu1 %vm365_vm1, %v390_v39 }
  0x3a   : > { %835 = vmatpush3.bf16.msra.mxu1 %v902_v40  ;;  %836 = vmatprep.mubr.msk.bf16.mxu1 %vm987_vm0, %v986_v0 }
  0xf7   : > { %v430_v43 = vpop.f32.mrf.mxu0 }
  0xf8   : > { %v476_v44 = vpack.c.bf16 %v430_v43, %v430_v43 }
  0xf9   : > { %v470_v45 = vpop.f32.mrf.mxu1  ;;  %v820_v46 = vpop.f32.mrf.mxu0 }
  0xfa   : > { %v528_v47 = vpack.c.bf16 %v470_v45, %v470_v45  ;;  %831 = vmatmul.mubr.msk.bf16.vlgmr.msra.gmra.mxu0 %vm365_vm1, %v476_v44 }
  0xfb   : > { %v826_v48 = vpop.f32.mrf.mxu1  ;;  %v433_v49 = vpop.f32.mrf.mxu0 }
  0xfc   : > { %837 = vmatmul.mubr.msk.bf16.vlgmr.msra.gmra.mxu1 %vm365_vm1, %v528_v47 }
  0xfd   : > { %v473_v50 = vpop.f32.mrf.mxu1  ;;  %v821_v51 = vpop.f32.mrf.mxu0 }
  0xff   : > { %v827_v52 = vpop.f32.mrf.mxu1 }
 0x1ba   : > { %v520_v53 = vpop.f32.mrf.mxu0 }
 0x1bb   : > { %527 = vst.msk [vmem:[%s333_s18] sm:$0xff] %vm526_vm2, %v520_v53 }
 0x1bc   : > { %v566_v54 = vpop.f32.mrf.mxu1  ;;  %v832_v55 = vpop.f32.mrf.mxu0 }
 0x1bd   : > { %572 = vst.msk [vmem:[%s343_s27] sm:$0xff] %vm526_vm2, %v566_v54 }
 0x1be   : > { %v838_v56 = vpop.f32.mrf.mxu1  ;;  %v523_v57 = vpop.f32.mrf.mxu0 }
 0x1c0   : > { %v569_v58 = vpop.f32.mrf.mxu1  ;;  %v833_v59 = vpop.f32.mrf.mxu0 }
 0x1c2   : > { %v839_v60 = vpop.f32.mrf.mxu1 }
 0x1c3 PF: > { %s19_s23 = sadd.s32 1, %s981_s23   ;;  %s1138_s18 = smov %s965_s19 }
 0x1c4   : > { %p16_p8 = scmp.ge.s32.totalorder %s19_s23, 4   ;;  %s1139_s19 = smov %s969_s20 }
 0x1c5   : > { %s1140_s20 = smov %s1063_s29  ;;  %s1141_s21 = smov %s977_s22 }
 0x1c6   : > { %s1142_s22 = smov %s1144_s25  ;;  %18 = sbr.rel (!%p16_p8) target bundleno = 4 (0x4), region = 98 }
 0x1cb   :  { %661 = vsyncpa [#allocation3], 1 }
 0x1cc   :  { %663 = vsyncpa [#allocation3 + $0x1], 1 }

// kernel: compress_jpeg.5
= control target key start
LH: loop header
LB: loop body
LE: loop exit
PB: predicated region body
PF: predicated region fallthrough
CT: control target
= control target key end

     0   :  { %s546_s12 = smov 0   ;;  %s548_s13 = smov 0   ;;  %s610_s0 = inlined_call_operand.vmem [shape: f32[2,8,128], index: 0, kind: input, shape index: {}]   ;;  %s611_s1 = inlined_call_operand.vmem [shape: bf16[128,128], index: 1, kind: input, shape index: {}]   ;;  %s612_s2 = inlined_call_operand.vmem [shape: f32[2,1,128], index: 2, kind: input, shape index: {}]   ;;  %s613_s3 = inlined_call_operand.vmem [shape: f32[2,8,128], index: 3, kind: output, shape index: {}]  }
   0x1   :  { %s550_s14 = smov 0  }
   0x2 LB: > { %s25_s15 = sadd.s32 1, %s518_s13  ;;  %p415_p0 = scmp.ge.s32.totalorder %s522_s14, 1  ;;  %s522_s14 = sphi %s550_s14, %s13_s14   ;;  %s518_s13 = sphi %s548_s13, %s615_s13   ;;  %s514_s12 = sphi %s546_s12, %s614_s12  }
   0x3   : > { %p27_p1 = scmp.ge.s32.totalorder %s25_s15, 2  ;;  %p163_p2 = scmp.lt.s32.totalorder %s522_s14, 3 }
   0x5   : > { %s617_s15 = smov (%p27_p1, %s25_s15), 0  ;;  %p164_p3 = pnand %p415_p0, %p163_p2 }
   0x6   : > { %p194_p4 = scmp.lt.s32.totalorder (!%p164_p3), %s514_s12, 1 }
   0x7   : > { %167 = sbr.rel (%p164_p3) target bundleno = 250 (0xfa), region = 32 }
   0xc   : > { %v492_v0 = vld [vmem:[%s611_s1 + $0x38] sm:$0xff]   ;;  %v524_v1 = vmov 0.0   ;;  %v493_v2 = vld [vmem:[%s611_s1 + $0x30] sm:$0xff]   ;;  %vm525_vm0 = vmmov 0   ;;  %v494_v3 = vld [vmem:[%s611_s1 + $0x28] sm:$0xff]   ;;  %s619_s12 = smov (!%p194_p4, %s514_s12), 1 }
   0xd   : > { %438 = vmatprep.subr.bf16.mxu0 %v524_v1  ;;  %454 = vmatprep.mubr.msk.bf16.mxu0 %vm525_vm0, %v524_v1  ;;  %v495_v4 = vld [vmem:[%s611_s1 + $0x20] sm:$0xff]   ;;  %v496_v5 = vld [vmem:[%s611_s1 + $0x18] sm:$0xff]   ;;  %v497_v6 = vld [vmem:[%s611_s1 + $0x10] sm:$0xff]   ;;  %s416_s28 = sshll.u32 %s619_s12, 3  ;;  %s203_s11 = scalar_lea.vmem %s612_s2, %s619_s12 }
   0xe   : > { %439 = vmatpush3.bf16.msra.mxu0 %v492_v0  ;;  %v498_v7 = vld [vmem:[%s611_s1 + $0x8] sm:$0xff]   ;;  %s200_s6 = scalar_lea.vmem %s610_s0, %s416_s28  ;;  %v499_v8 = vld [vmem:[%s611_s1] sm:$0xff]   ;;  %s210_s18 = scalar_lea.vmem %s613_s3, %s416_s28 }
   0xf   : > { %440 = vmatprep.subr.bf16.mxu0 %v524_v1  ;;  %v212_v9 = vld [vmem:[%s200_s6] sm:$0xff] }
  0x10   : > { %v213_v10 = vpack.c.bf16 %v212_v9, %v212_v9  ;;  %v426_v11 = vld [vmem:[%s203_s11] ss:$0 sm:$0xff] }
  0x12   : > { %441 = vmatpush3.bf16.msra.mxu0 %v493_v2 }
  0x13   : > { %442 = vmatprep.subr.bf16.mxu0 %v524_v1 }
  0x16   : > { %443 = vmatpush3.bf16.msra.mxu0 %v494_v3 }
  0x17   : > { %444 = vmatprep.subr.bf16.mxu0 %v524_v1 }
  0x1a   : > { %445 = vmatpush3.bf16.msra.mxu0 %v495_v4 }
  0x1b   : > { %446 = vmatprep.subr.bf16.mxu0 %v524_v1 }
  0x1e   : > { %447 = vmatpush3.bf16.msra.mxu0 %v496_v5 }
  0x1f   : > { %448 = vmatprep.subr.bf16.mxu0 %v524_v1 }
  0x22   : > { %449 = vmatpush3.bf16.msra.mxu0 %v497_v6 }
  0x23   : > { %450 = vmatprep.subr.bf16.mxu0 %v524_v1 }
  0x26   : > { %451 = vmatpush3.bf16.msra.mxu0 %v498_v7 }
  0x27   : > { %452 = vmatprep.subr.bf16.mxu0 %v524_v1 }
  0x2a   : > { %453 = vmatpush3.bf16.msra.mxu0 %v499_v8 }
  0x2d   : > { %455 = vmatmul.mubr.bf16.vlgmr.msra.gmra.mxu0 %v213_v10 }
  0xed   : > { %v312_v12 = vpop.f32.mrf.mxu0 }
  0xee   : > { %v325_v13 = vmul.f32 %v426_v11, %v312_v12 }
  0xef   : > { %v456_v14 = vpop.f32.mrf.mxu0 }
  0xf0   : > { %v460_v15 = vcvt.f32.s32 %v325_v13  ;;  %v458_v18 = vand.u32 2147483647, %v325_v13  ;;  %v463_v21 = vand.u32 2147483648, %v325_v13 }
  0xf1   : > { %v315_v16 = vpop.f32.mrf.mxu0 }
  0xf2   : > { %v461_v17 = vcvt.s32.f32 %v460_v15  ;;  %vm459_vm1 = vcmp.lt.f32.partialorder %v458_v18, 8388608.0 }
  0xf3   : > { %v457_v19 = vpop.f32.mrf.mxu0 }
  0xf4   : > { %v462_v20 = vand.u32 2147483647, %v461_v17 }
  0xf6   : > { %v464_v22 = vor.u32 %v463_v21, %v462_v20 }
  0xf8   : > { %v465_v23 = vsel %vm459_vm1, %v464_v22, %v325_v13 }
  0xf9   : > { %327 = vst [vmem:[%s210_s18] sm:$0xff] %v465_v23 }
  0xfa PF: > { %s13_s14 = sadd.s32 1, %s522_s14   ;;  %s614_s12 = smov %s518_s13 }
  0xfb   : > { %p10_p5 = scmp.ge.s32.totalorder %s13_s14, 4   ;;  %s615_s13 = smov %s617_s15 }
  0xfd   :  { %12 = sbr.rel (!%p10_p5) target bundleno = 2 (0x2), region = 65 }

</bundles_post_ra>
